<compile_context>
chip_gen: v5e
topology: v5e:2x2
jax: 0.10.0
libtpu: 0.0.40
codegen_flags: <defaults>
</compile_context>

<pallas_src>
import functools

import jax
import jax.numpy as jnp
from jax.experimental import pallas as pl
from jax.experimental.pallas import tpu as pltpu

LANE = 128      # vreg lane width
SUBLANE = 8     # vreg sublane count (f32)


def _round_up(x, m):
    return (x + m - 1) // m * m


# ---------------------------------------------------------------------------
# Fused kernel: whole MLP in one body; layer loop is statically unrolled.
# refs = (x_ref, W_0..W_{L-1}, bias_0..bias_{L-1}, out_ref)
# ---------------------------------------------------------------------------
def _fused_mlp_kernel(*refs, n_layers, relu_flags, compute_dtype):
    x_ref = refs[0]
    w_refs = refs[1:1 + n_layers]
    b_refs = refs[1 + n_layers:1 + 2 * n_layers]
    out_ref = refs[1 + 2 * n_layers]

    h = x_ref[...].astype(jnp.float32)
    for l in range(n_layers):
        # Single MXU matmul per complex layer (real block-matrix formulation).
        y = jnp.dot(h.astype(compute_dtype), w_refs[l][...],
                    preferred_element_type=jnp.float32)
        # Bias add + CReLU kept in f32 (safe on v5e's non-bf16 VPU).
        y = y + b_refs[l][...].astype(jnp.float32)
        if relu_flags[l]:                       # ComplexRelu == elementwise relu on [yr | yi]
            y = jnp.maximum(y, 0.0)
        h = y                                   # stays in vregs/VMEM for the next layer

    out_ref[...] = h.astype(out_ref.dtype)


# ---------------------------------------------------------------------------
# Parameter preparation (one-time, outside the hot path)
# ---------------------------------------------------------------------------
def init_mlp_params(key, layer_sizes, input_size):
    """Deterministic init mirroring MlpNetwork.__init__ layer shapes.

    Each WidelyLinearLayer(l_in, l_out) gets complex A, B weights and a complex bias,
    stored as real/imag pairs with weights pre-transposed to (in, out)."""
    sizes = [input_size] + list(layer_sizes)
    params = []
    for l_id in range(len(sizes) - 1):
        f_in, f_out = sizes[l_id], sizes[l_id + 1]
        key, *ks = jax.random.split(key, 7)
        scale = 1.0 / jnp.sqrt(jnp.float32(f_in))
        Ar = jax.random.normal(ks[0], (f_in, f_out), jnp.float32) * scale
        Ai = jax.random.normal(ks[1], (f_in, f_out), jnp.float32) * scale
        Br = jax.random.normal(ks[2], (f_in, f_out), jnp.float32) * scale
        Bi = jax.random.normal(ks[3], (f_in, f_out), jnp.float32) * scale
        br = jax.random.normal(ks[4], (1, f_out), jnp.float32) * 0.01
        bi = jax.random.normal(ks[5], (1, f_out), jnp.float32) * 0.01
        params.append((Ar, Ai, Br, Bi, br, bi))
    return params


def prepare_mlp_params(params, compute_dtype=jnp.float32):
    """Combine each layer's (Ar,Ai,Br,Bi,br,bi) into one real block weight
    W = [[Ar+Br, Ai+Bi], [Bi-Ai, Ar-Br]]  (2*in, 2*out)  and one bias (1, 2*out),
    zero-padded so lane dims are multiples of 128 (padded lanes stay exactly 0
    through matmul/relu, so results are unchanged)."""
    prepared = []
    for (Ar, Ai, Br, Bi, br, bi) in params:
        f_in, f_out = Ar.shape
        W = jnp.block([[Ar + Br, Ai + Bi],
                       [Bi - Ai, Ar - Br]])           # (2*in, 2*out)
        b = jnp.concatenate([br, bi], axis=-1)        # (1, 2*out)
        rp = _round_up(2 * f_in, LANE)
        cp = _round_up(2 * f_out, LANE)
        W = jnp.pad(W, ((0, rp - 2 * f_in), (0, cp - 2 * f_out)))
        b = jnp.pad(b, ((0, 0), (0, cp - 2 * f_out)))
        prepared.append((W.astype(compute_dtype), b.astype(jnp.float32)))
    return prepared


# ---------------------------------------------------------------------------
# Forward pass: one pallas_call for the whole network
# ---------------------------------------------------------------------------
def mlp_network_forward(xr, xi, params, *, compute_dtype=jnp.float32,
                        batch_tile=128):
    """MlpNetwork.forward. compute_dtype=jnp.bfloat16 selects bf16 MXU operands
    (recommended on v6e/v7x); bias/relu/accumulation remain f32."""
    prepared = prepare_mlp_params(params, compute_dtype)   # hoist out of loops in real use
    n_layers = len(prepared)
    relu_flags = tuple(l != n_layers - 1 for l in range(n_layers))

    batch, in_f = xr.shape
    out_f = params[-1][0].shape[1]
    fin_pad = prepared[0][0].shape[0]        # padded 2*input_size
    fout_pad = prepared[-1][0].shape[1]      # padded 2*last_out

    # Lane-dense input layout: [xr | xi | 0-pad]; batch padded to a multiple of the tile.
    x = jnp.concatenate([xr, xi], axis=-1)
    x = jnp.pad(x, ((0, 0), (0, fin_pad - 2 * in_f)))
    bpad = _round_up(batch, SUBLANE)
    tb = min(bpad, batch_tile)
    bpad = _round_up(bpad, tb)
    x = jnp.pad(x, ((0, bpad - batch), (0, 0))).astype(compute_dtype)

    in_specs = [pl.BlockSpec((tb, fin_pad), lambda b: (b, 0))]
    for (W, _) in prepared:      # weights: same block every grid step -> stay resident in VMEM
        rp, cp = W.shape
        in_specs.append(pl.BlockSpec((rp, cp), lambda b: (0, 0)))
    for (_, bias) in prepared:
        cp = bias.shape[1]
        in_specs.append(pl.BlockSpec((1, cp), lambda b: (0, 0)))
    out_specs = pl.BlockSpec((tb, fout_pad), lambda b: (b, 0))

    kernel = functools.partial(_fused_mlp_kernel, n_layers=n_layers,
                               relu_flags=relu_flags, compute_dtype=compute_dtype)

    y = pl.pallas_call(
        kernel,
        out_shape=jax.ShapeDtypeStruct((bpad, fout_pad), jnp.float32),
        grid=(bpad // tb,),
        in_specs=in_specs,
        out_specs=out_specs,
        compiler_params=pltpu.CompilerParams(
            dimension_semantics=("parallel",)),   # batch tiles split across TCs (v7x)
    )(x, *[W for W, _ in prepared], *[b for _, b in prepared])

    yr = y[:batch, :out_f]
    yi = y[:batch, out_f:2 * out_f]
    return yr, yi


# ---------------------------------------------------------------------------
# Pure-JAX complex reference for correctness
# ---------------------------------------------------------------------------
def _reference_forward(xr, xi, params):
    x = xr + 1j * xi.astype(jnp.complex64)
    n_layers = len(params)
    for l_id, (Ar, Ai, Br, Bi, br, bi) in enumerate(params):
        A = Ar + 1j * Ai
        B = Br + 1j * Bi
        b = br + 1j * bi
        y = x @ A + jnp.conj(x) @ B + b
        if l_id != n_layers - 1:
            y = jnp.maximum(y.real, 0.0) + 1j * jnp.maximum(y.imag, 0.0)
        x = y
    return x.real, x.imag


if __name__ == "__main__":
    key = jax.random.PRNGKey(0)
    kx, kp = jax.random.split(key)

    batch = 8
    input_size = 32
    layer_sizes = [32, 16]   # two WidelyLinearLayers; ComplexRelu after the first only

    kxr, kxi = jax.random.split(kx)
    xr = jax.random.normal(kxr, (batch, input_size), jnp.float32)
    xi = jax.random.normal(kxi, (batch, input_size), jnp.float32)

    params = init_mlp_params(kp, layer_sizes, input_size)

    yr, yi = mlp_network_forward(xr, xi, params)          # f32 path (use bf16 on v6e/v7x if desired)
    yr = jax.block_until_ready(yr)
    yi = jax.block_until_ready(yi)

    # correctness check against pure-JAX complex math
    rr, ri = _reference_forward(xr, xi, params)
    assert jnp.allclose(yr, rr, atol=1e-4, rtol=1e-4)
    assert jnp.allclose(yi, ri, atol=1e-4, rtol=1e-4)

    print("KERNEL_OK")
</pallas_src>

<mosaic_0001>
module attributes {stable_mosaic.version = 11 : i64} {
  func.func @_fused_mlp_kernel(%arg0: i32, %arg1: memref<8x128xf32, #tpu.memory_space<vmem>>, %arg2: memref<128x128xf32, #tpu.memory_space<vmem>>, %arg3: memref<128x128xf32, #tpu.memory_space<vmem>>, %arg4: memref<1x128xf32, #tpu.memory_space<vmem>>, %arg5: memref<1x128xf32, #tpu.memory_space<vmem>>, %arg6: memref<8x128xf32, #tpu.memory_space<vmem>>) attributes {dimension_semantics = [#tpu.dimension_semantics<parallel>], iteration_bounds = array<i64: 1>, scalar_prefetch = 0 : i64, scratch_operands = 0 : i64, tpu.core_type = #tpu.core_type<tc>, window_params = [{transform_indices = @transform_0, window_bounds = array<i64: 8, 128>}, {pipeline_mode = #tpu.pipeline_mode<synchronous>, transform_indices = @transform_1, window_bounds = array<i64: 128, 128>}, {pipeline_mode = #tpu.pipeline_mode<synchronous>, transform_indices = @transform_2, window_bounds = array<i64: 128, 128>}, {pipeline_mode = #tpu.pipeline_mode<synchronous>, transform_indices = @transform_3, window_bounds = array<i64: 1, 128>}, {pipeline_mode = #tpu.pipeline_mode<synchronous>, transform_indices = @transform_4, window_bounds = array<i64: 1, 128>}, {transform_indices = @transform_5, window_bounds = array<i64: 8, 128>}]} {
    %c0 = arith.constant 0 : index
    %c0_0 = arith.constant 0 : index
    %0 = vector.load %arg1[%c0, %c0_0] : memref<8x128xf32, #tpu.memory_space<vmem>>, vector<8x128xf32>
    %c0_1 = arith.constant 0 : index
    %c0_2 = arith.constant 0 : index
    %1 = vector.load %arg2[%c0_1, %c0_2] : memref<128x128xf32, #tpu.memory_space<vmem>>, vector<128x128xf32>
    %cst = arith.constant dense<0.000000e+00> : vector<8x128xf32>
    %2 = tpu.matmul %0, %1, %cst {dimension_numbers = #tpu.dot_dimension_numbers<[1], [0], [0], [1], [0, 0, 1, 1], [], []>} : vector<8x128xf32>, vector<128x128xf32>, vector<8x128xf32> -> vector<8x128xf32>
    %c0_3 = arith.constant 0 : index
    %c0_4 = arith.constant 0 : index
    %3 = vector.load %arg4[%c0_3, %c0_4] : memref<1x128xf32, #tpu.memory_space<vmem>>, vector<1x128xf32>
    %4 = vector.broadcast %3 : vector<1x128xf32> to vector<8x128xf32>
    %5 = arith.addf %2, %4 : vector<8x128xf32>
    %cst_5 = arith.constant 0.000000e+00 : f32
    %6 = vector.broadcast %cst_5 : f32 to vector<8x128xf32>
    %7 = arith.maximumf %5, %6 : vector<8x128xf32>
    %c0_6 = arith.constant 0 : index
    %c0_7 = arith.constant 0 : index
    %8 = vector.load %arg3[%c0_6, %c0_7] : memref<128x128xf32, #tpu.memory_space<vmem>>, vector<128x128xf32>
    %cst_8 = arith.constant dense<0.000000e+00> : vector<8x128xf32>
    %9 = tpu.matmul %7, %8, %cst_8 {dimension_numbers = #tpu.dot_dimension_numbers<[1], [0], [0], [1], [0, 0, 1, 1], [], []>} : vector<8x128xf32>, vector<128x128xf32>, vector<8x128xf32> -> vector<8x128xf32>
    %c0_9 = arith.constant 0 : index
    %c0_10 = arith.constant 0 : index
    %10 = vector.load %arg5[%c0_9, %c0_10] : memref<1x128xf32, #tpu.memory_space<vmem>>, vector<1x128xf32>
    %11 = vector.broadcast %10 : vector<1x128xf32> to vector<8x128xf32>
    %12 = arith.addf %9, %11 : vector<8x128xf32>
    %c0_11 = arith.constant 0 : index
    %c0_12 = arith.constant 0 : index
    %13 = vector.load %arg6[%c0_11, %c0_12] : memref<8x128xf32, #tpu.memory_space<vmem>>, vector<8x128xf32>
    tpu.vector_store %arg6[%c0_11, %c0_12], %12 {strides = array<i32>} : memref<8x128xf32, #tpu.memory_space<vmem>>, vector<8x128xf32>,
    return
  }
  func.func @transform_0(%arg0: i32) -> (i32, i32) {
    %c0_i32 = arith.constant 0 : i32
    %c0_i32_0 = arith.constant 0 : i32
    return %arg0, %c0_i32 : i32, i32
  }
  func.func @transform_1(%arg0: i32) -> (i32, i32) {
    %c0_i32 = arith.constant 0 : i32
    %c0_i32_0 = arith.constant 0 : i32
    %c0_i32_1 = arith.constant 0 : i32
    return %c0_i32, %c0_i32_0 : i32, i32
  }
  func.func @transform_2(%arg0: i32) -> (i32, i32) {
    %c0_i32 = arith.constant 0 : i32
    %c0_i32_0 = arith.constant 0 : i32
    %c0_i32_1 = arith.constant 0 : i32
    return %c0_i32, %c0_i32_0 : i32, i32
  }
  func.func @transform_3(%arg0: i32) -> (i32, i32) {
    %c0_i32 = arith.constant 0 : i32
    %c0_i32_0 = arith.constant 0 : i32
    %c0_i32_1 = arith.constant 0 : i32
    return %c0_i32, %c0_i32_0 : i32, i32
  }
  func.func @transform_4(%arg0: i32) -> (i32, i32) {
    %c0_i32 = arith.constant 0 : i32
    %c0_i32_0 = arith.constant 0 : i32
    %c0_i32_1 = arith.constant 0 : i32
    return %c0_i32, %c0_i32_0 : i32, i32
  }
  func.func @transform_5(%arg0: i32) -> (i32, i32) {
    %c0_i32 = arith.constant 0 : i32
    %c0_i32_0 = arith.constant 0 : i32
    return %arg0, %c0_i32 : i32, i32
  }
}

</mosaic_0001>

<bundles_post_ra>
// kernel: tpu_custom_call.1
= control target key start
LH: loop header
LB: loop body
LE: loop exit
PB: predicated region body
PF: predicated region fallthrough
CT: control target
= control target key end

     0   :  { %10 = vsyncpa [#allocation3], 0  ;;  %s331_s0 = inlined_call_operand.hbm [shape: f32[8,128], index: 0, kind: input, shape index: {}]   ;;  %s332_s1 = inlined_call_operand.hbm [shape: f32[128,128], index: 1, kind: input, shape index: {}]   ;;  %s333_s2 = inlined_call_operand.hbm [shape: f32[128,128], index: 2, kind: input, shape index: {}]   ;;  %s334_s3 = inlined_call_operand.vmem [shape: f32[1,128], index: 3, kind: input, shape index: {}]   ;;  %s335_s4 = inlined_call_operand.vmem [shape: f32[1,128], index: 4, kind: input, shape index: {}]   ;;  %s336_s5 = inlined_call_operand.hbm [shape: f32[8,128], index: 5, kind: output, shape index: {}]  }
   0x1   :  { %11 = vsyncpa [#allocation6], 0  ;;  %s28_s20 = sshll.u32 %s332_s1, 4  ;;  %s29_s20 = int_to_ptr.hbm [resolvable:$true] %s28_s20 }
   0x2   :  { %12 = vsyncpa [#allocation4], 0  ;;  %s277_s21 = smov [#allocation5]   ;;  %s18_s25 = sshll.u32 %s331_s0, 4  ;;  %s19_s25 = int_to_ptr.hbm [resolvable:$true] %s18_s25 }
   0x3   :  { %s30_s22 = sshll.u32 %s277_s21, 4  ;;  %s278_s26 = smov 128   ;;  %s31_s22 = int_to_ptr.vmem [resolvable:$true] %s30_s22 }
   0x4   :  { %s279_s27 = smov 8   ;;  %s280_s28 = smov [#allocation2]  }
   0x5   :  { %36 = dma.hbm_to_vmem [thread:$0]  %s29_s20, 2048, %s31_s22, [#allocation6], %s278_s26, %s278_s26, %s279_s27  }
   0x6   :  { %s20_s29 = sshll.u32 %s280_s28, 4  ;;  %s41_s7 = sshll.u32 %s333_s2, 4  ;;  %s21_s29 = int_to_ptr.vmem [resolvable:$true] %s20_s29  ;;  %s42_s7 = int_to_ptr.hbm [resolvable:$true] %s41_s7 }
   0x7   :  { %23 = dma.hbm_to_vmem [thread:$0]  %s19_s25, 128, %s21_s29, [#allocation3]  }
   0x8   :  { %s281_s1 = smov [#allocation7]  }
   0x9   :  { %s43_s8 = sshll.u32 %s281_s1, 4  ;;  %s44_s8 = int_to_ptr.vmem [resolvable:$true] %s43_s8 }
   0xa   :  { %49 = dma.hbm_to_vmem [thread:$0]  %s42_s7, 2048, %s44_s8, [#allocation6], %s278_s26, %s278_s26, %s279_s27  }
   0xb   :  { %271 = dma.done.wait [#allocation3], 128  }
   0xc   :  { %272 = vsyncadd [#allocation3], 4294967168 }
   0xd   :  { %273 = dma.done.wait [#allocation6], 4096  }
   0xe   :  { %274 = vsyncadd [#allocation6], 4294963200  ;;  %v82_v0 = vld [vmem:[#allocation5 + $0x78] sm:$0xff]  ;;  %v81_v1 = vld [vmem:[#allocation5 + $0x70] sm:$0xff]  ;;  %s282_s11 = smov [#allocation8]   ;;  %s156_s15 = sshll.u32 %s336_s5, 4  ;;  %s157_s15 = int_to_ptr.hbm [resolvable:$true] %s156_s15 }
   0xf   :  { %87 = vmatpush.msra.mxu0 %v82_v0  ;;  %v80_v2 = vld [vmem:[#allocation5 + $0x68] sm:$0xff]  ;;  %v79_v3 = vld [vmem:[#allocation5 + $0x60] sm:$0xff]  ;;  %v123_v4 = vld [vmem:[#allocation7 + $0x78] sm:$0xff]  ;;  %s154_s12 = sshll.u32 %s282_s11, 4  ;;  %s155_s12 = int_to_ptr.vmem [resolvable:$true] %s154_s12 }
  0x10   :  { %v78_v5 = vld [vmem:[#allocation5 + $0x58] sm:$0xff]  ;;  %128 = vmatpush.msra.mxu1 %v123_v4  ;;  %v122_v6 = vld [vmem:[#allocation7 + $0x70] sm:$0xff]  ;;  %v121_v7 = vld [vmem:[#allocation7 + $0x68] sm:$0xff] }
  0x11   :  { %88 = vmatpush.msra.mxu0 %v81_v1  ;;  %v77_v8 = vld [vmem:[#allocation5 + $0x50] sm:$0xff]  ;;  %v120_v9 = vld [vmem:[#allocation7 + $0x60] sm:$0xff]  ;;  %v76_v10 = vld [vmem:[#allocation5 + $0x48] sm:$0xff] }
  0x12   :  { %129 = vmatpush.msra.mxu1 %v122_v6  ;;  %v119_v11 = vld [vmem:[#allocation7 + $0x58] sm:$0xff]  ;;  %v75_v12 = vld [vmem:[#allocation5 + $0x40] sm:$0xff]  ;;  %v118_v13 = vld [vmem:[#allocation7 + $0x50] sm:$0xff] }
  0x13   :  { %89 = vmatpush.msra.mxu0 %v80_v2  ;;  %v74_v14 = vld [vmem:[#allocation5 + $0x38] sm:$0xff]  ;;  %v117_v15 = vld [vmem:[#allocation7 + $0x48] sm:$0xff]  ;;  %v73_v16 = vld [vmem:[#allocation5 + $0x30] sm:$0xff] }
  0x14   :  { %130 = vmatpush.msra.mxu1 %v121_v7  ;;  %v116_v17 = vld [vmem:[#allocation7 + $0x40] sm:$0xff]  ;;  %v72_v18 = vld [vmem:[#allocation5 + $0x28] sm:$0xff]  ;;  %v115_v19 = vld [vmem:[#allocation7 + $0x38] sm:$0xff] }
  0x15   :  { %90 = vmatpush.msra.mxu0 %v79_v3  ;;  %v71_v20 = vld [vmem:[#allocation5 + $0x20] sm:$0xff]  ;;  %v114_v21 = vld [vmem:[#allocation7 + $0x30] sm:$0xff]  ;;  %v70_v22 = vld [vmem:[#allocation5 + $0x18] sm:$0xff] }
  0x16   :  { %131 = vmatpush.msra.mxu1 %v120_v9  ;;  %v113_v23 = vld [vmem:[#allocation7 + $0x28] sm:$0xff]  ;;  %v69_v24 = vld [vmem:[#allocation5 + $0x10] sm:$0xff]  ;;  %v112_v25 = vld [vmem:[#allocation7 + $0x20] sm:$0xff] }
  0x17   :  { %91 = vmatpush.msra.mxu0 %v78_v5  ;;  %v68_v26 = vld [vmem:[#allocation5 + $0x8] sm:$0xff]  ;;  %v111_v27 = vld [vmem:[#allocation7 + $0x18] sm:$0xff]  ;;  %v67_v28 = vld [vmem:[#allocation5] sm:$0xff] }
  0x18   :  { %132 = vmatpush.msra.mxu1 %v119_v11  ;;  %v66_v29 = vld [vmem:[#allocation2] sm:$0xff]  ;;  %v110_v30 = vld [vmem:[#allocation7 + $0x10] sm:$0xff]  ;;  %v109_v31 = vld [vmem:[#allocation7 + $0x8] sm:$0xff] }
  0x19   :  { %92 = vmatpush.msra.mxu0 %v77_v8  ;;  %v108_v32 = vld [vmem:[#allocation7] sm:$0xff]  ;;  %v173_v33 = vld [vmem:[%s334_s3] ss:$0 sm:$0xff] }
  0x1a   :  { %133 = vmatpush.msra.mxu1 %v118_v13  ;;  %v174_v37 = vld [vmem:[%s335_s4] ss:$0 sm:$0xff] }
  0x1b   :  { %93 = vmatpush.msra.mxu0 %v76_v10 }
  0x1c   :  { %134 = vmatpush.msra.mxu1 %v117_v15 }
  0x1d   :  { %94 = vmatpush.msra.mxu0 %v75_v12 }
  0x1e   :  { %135 = vmatpush.msra.mxu1 %v116_v17 }
  0x1f   :  { %95 = vmatpush.msra.mxu0 %v74_v14 }
  0x20   :  { %136 = vmatpush.msra.mxu1 %v115_v19 }
  0x21   :  { %96 = vmatpush.msra.mxu0 %v73_v16 }
  0x22   :  { %137 = vmatpush.msra.mxu1 %v114_v21 }
  0x23   :  { %97 = vmatpush.msra.mxu0 %v72_v18 }
  0x24   :  { %138 = vmatpush.msra.mxu1 %v113_v23 }
  0x25   :  { %98 = vmatpush.msra.mxu0 %v71_v20 }
  0x26   :  { %139 = vmatpush.msra.mxu1 %v112_v25 }
  0x27   :  { %99 = vmatpush.msra.mxu0 %v70_v22 }
  0x28   :  { %140 = vmatpush.msra.mxu1 %v111_v27 }
  0x29   :  { %100 = vmatpush.msra.mxu0 %v69_v24 }
  0x2a   :  { %141 = vmatpush.msra.mxu1 %v110_v30 }
  0x2b   :  { %101 = vmatpush.msra.mxu0 %v68_v26 }
  0x2c   :  { %142 = vmatpush.msra.mxu1 %v109_v31 }
  0x2d   :  { %102 = vmatpush.msra.mxu0 %v67_v28 }
  0x2e   :  { %103 = vmatmul.f32.vlgmr.msra.gmra.mxu0 %v66_v29  ;;  %143 = vmatpush.msra.mxu1 %v108_v32 }
  0xab   :  { %v104_v34 = vpop.f32.mrf.mxu0 }
  0xac   :  { %v105_v35 = vadd.f32 %v173_v33, %v104_v34 }
  0xae   :  { %v107_v36 = vmax.f32 %v105_v35, 0.0 }
  0xb0   :  { %144 = vmatmul.f32.vlgmr.msra.gmra.mxu1 %v107_v36 }
 0x12d   :  { %v145_v38 = vpop.f32.mrf.mxu1 }
 0x12e   :  { %v146_v39 = vadd.f32 %v174_v37, %v145_v38 }
 0x130   :  { %148 = vst [vmem:[#allocation8] sm:$0xff] %v146_v39 }
 0x131   :  { %159 = dma.vmem_to_hbm [thread:$0]  %s155_s12, 128, %s157_s15, [#allocation4]  }
 0x132   :  { %275 = dma.done.wait [#allocation4], 128  }
 0x133   :  { %276 = vsyncadd [#allocation4], 4294967168 }
 0x134   :  { %164 = vsyncpa [#allocation3], 1 }
 0x135   :  { %165 = vsyncpa [#allocation6], 1 }
 0x136   :  { %166 = vsyncpa [#allocation4], 1 }

</bundles_post_ra>
